<compile_context>
chip_gen: v5e
topology: v5e:2x2
jax: 0.10.0
libtpu: 0.0.40
codegen_flags: <defaults>
</compile_context>

<pallas_src>
import functools

import jax
import jax.numpy as jnp
from jax.experimental import pallas as pl
from jax.experimental.pallas import tpu as pltpu

LANE = 128


def _set_lstm_kernel(cd_ref, cp_ref, emb_ref, wihd_ref, wihp_ref, whh_ref,
                     b_ref, w1_ref, b1_ref, w2_ref, b2_ref,
                     out_ref,
                     *, hidden0, seq_len, inv_md, inv_mp):
    H = hidden0
    T = seq_len
    bf16 = jnp.bfloat16

    # ---- fused embedding lookup + set aggregation (counts @ table, MXU) ----
    # torch: mean over codes-in-set (dim=1) then sum over sets (dim=0); with
    # fixed set size m this equals (integer code counts) @ emb * (1/m).
    emb = emb_ref[...]                                                   # (Vp, E) bf16
    d_agg = jnp.dot(cd_ref[...], emb,
                    preferred_element_type=jnp.float32) * inv_md         # (T, E) f32
    p_agg = jnp.dot(cp_ref[...], emb,
                    preferred_element_type=jnp.float32) * inv_mp         # (T, E) f32

    # ---- hoisted input projection: x @ W_ih + b as two half matmuls --------
    # (avoids an in-kernel lane concat of [d_agg | p_agg]).
    x_proj = (jnp.dot(d_agg.astype(bf16), wihd_ref[...],
                      preferred_element_type=jnp.float32)
              + jnp.dot(p_agg.astype(bf16), wihp_ref[...],
                        preferred_element_type=jnp.float32)
              + b_ref[...])                                              # (T, 4H) f32

    # ---- LSTM recurrence (batch=1), fully unrolled, state kept in vregs ----
    whh = whh_ref[...]                       # (H, 4H) bf16, loaded ONCE
    h = jnp.zeros((1, H), jnp.float32)
    c = jnp.zeros((1, H), jnp.float32)
    hs = []
    for t in range(T):                       # T small & static -> full unroll
        gates = x_proj[t:t + 1, :] + jnp.dot(h.astype(bf16), whh,
                                             preferred_element_type=jnp.float32)
        sig = jax.nn.sigmoid(gates)          # one full-width (1,4H) EUP push
        i_g = sig[:, 0:H]
        f_g = sig[:, H:2 * H]
        o_g = sig[:, 3 * H:4 * H]
        g_g = jnp.tanh(gates[:, 2 * H:3 * H])   # tanh restricted to g slice
        c = f_g * c + i_g * g_g
        h = o_g * jnp.tanh(c)
        hs.append(h)                         # stays in registers, no VMEM store
    outs = jnp.concatenate(hs, axis=0)       # (T, H) f32, one vreg tile

    # ---- MLP head -----------------------------------------------------------
    # TODO(synk): nn.Dropout is identity in eval mode; training-mode dropout
    # (and the unused single-layer LSTM dropout arg) is not implemented.
    hid1 = jnp.maximum(
        jnp.dot(outs.astype(bf16), w1_ref[...],
                preferred_element_type=jnp.float32) + b1_ref[...], 0.0)   # (T, H1)
    # output weights are zero-padded to 128 lanes -> unmasked lane-dense store
    out_ref[...] = (jnp.dot(hid1.astype(bf16), w2_ref[...],
                            preferred_element_type=jnp.float32)
                    + b2_ref[...])                                        # (T, 128)


@functools.partial(jax.jit, static_argnames=("n_class",))
def embedded_set_lstm_forward(diag_idx, proc_idx, params, *, n_class):
    """diag_idx: (T, n_d, m_d) int32; proc_idx: (T, n_p, m_p) int32."""
    T, _, m_d = diag_idx.shape
    _, _, m_p = proc_idx.shape
    Vp, _ = params["embedding"].shape
    H0 = params["w_hh"].shape[0]

    # --- per-visit code-count matrices (exact small-int counts, bf16-safe) ---
    # TODO(synk): assumes every set has exactly m real codes (no padding idx).
    cd = jax.nn.one_hot(diag_idx.reshape(T, -1), Vp,
                        dtype=jnp.float32).sum(axis=1).astype(jnp.bfloat16)  # (T, Vp)
    cp = jax.nn.one_hot(proc_idx.reshape(T, -1), Vp,
                        dtype=jnp.float32).sum(axis=1).astype(jnp.bfloat16)  # (T, Vp)

    vmem = pl.BlockSpec(memory_space=pltpu.MemorySpace.VMEM)
    kern = functools.partial(_set_lstm_kernel, hidden0=H0, seq_len=T,
                             inv_md=1.0 / m_d, inv_mp=1.0 / m_p)

    logits_padded = pl.pallas_call(
        kern,
        out_shape=jax.ShapeDtypeStruct((T, LANE), jnp.float32),
        in_specs=[vmem] * 11,
        out_specs=vmem,
    )(cd, cp,
      params["embedding"], params["w_ih_d"], params["w_ih_p"],
      params["w_hh"], params["b"],
      params["w1"], params["b1"], params["w2"], params["b2"])

    return logits_padded[:, :n_class]


def init_params(key, vocab_size, embedding_dim, hidden_dim, n_class):
    H0, H1 = hidden_dim
    E = embedding_dim
    Vp = ((vocab_size + 15) // 16) * 16        # sublane-friendly padded vocab
    ks = jax.random.split(key, 10)

    def unif(k, shape, fan):
        bound = 1.0 / jnp.sqrt(fan)
        return jax.random.uniform(k, shape, jnp.float32, -bound, bound)

    emb = jax.random.normal(ks[0], (vocab_size, E), jnp.float32)
    emb = jnp.zeros((Vp, E), jnp.float32).at[:vocab_size].set(emb)

    # Weights stored pre-transposed (in_features, out_features) so the kernel
    # computes x @ W with no in-kernel transpose.  Matmul weights are bf16
    # (MXU-native); biases stay f32.
    w_ih = unif(ks[1], (2 * E, 4 * H0), H0)
    w2 = unif(ks[7], (H1, n_class), H1)
    b2 = unif(ks[8], (1, n_class), H1)

    return {
        "embedding": emb.astype(jnp.bfloat16),                     # (Vp, E)
        "w_ih_d": w_ih[:E].astype(jnp.bfloat16),                   # (E, 4H0)
        "w_ih_p": w_ih[E:].astype(jnp.bfloat16),                   # (E, 4H0)
        "w_hh": unif(ks[2], (H0, 4 * H0), H0).astype(jnp.bfloat16),
        # b = b_ih + b_hh (identical to PyTorch's two biases at inference)
        "b": unif(ks[3], (1, 4 * H0), H0) + unif(ks[4], (1, 4 * H0), H0),
        "w1": unif(ks[5], (H0, H1), H0).astype(jnp.bfloat16),
        "b1": unif(ks[6], (1, H1), H0),
        # pre-padded lane-dense output layer (pad n_class -> 128 once here)
        "w2": jnp.zeros((H1, LANE), jnp.bfloat16)
                 .at[:, :n_class].set(w2.astype(jnp.bfloat16)),
        "b2": jnp.zeros((1, LANE), jnp.float32).at[:, :n_class].set(b2),
    }


if __name__ == "__main__":
    T = 8            # number of visits (sequence length)
    E = 16           # embedding_dim  -> LSTM input = 2E = 32
    HIDDEN = (32, 16)
    N_CLASS = 8
    VOCAB = 50
    N_D, M_D = 3, 4  # diagnosis sets per visit, codes per set
    N_P, M_P = 2, 5  # procedure sets per visit, codes per set

    key = jax.random.PRNGKey(0)
    k_par, k_d, k_p = jax.random.split(key, 3)

    params = init_params(k_par, VOCAB, E, HIDDEN, N_CLASS)
    diag_idx = jax.random.randint(k_d, (T, N_D, M_D), 0, VOCAB, jnp.int32)
    proc_idx = jax.random.randint(k_p, (T, N_P, M_P), 0, VOCAB, jnp.int32)

    logits = embedded_set_lstm_forward(diag_idx, proc_idx, params,
                                       n_class=N_CLASS)
    jax.block_until_ready(logits)
    assert logits.shape == (T, N_CLASS), logits.shape
    print("KERNEL_OK")
</pallas_src>

<mosaic_0001>
module attributes {stable_mosaic.version = 11 : i64} {
  func.func @_set_lstm_kernel(%arg0: memref<8x64xbf16, #tpu.memory_space<vmem>>, %arg1: memref<8x64xbf16, #tpu.memory_space<vmem>>, %arg2: memref<64x16xbf16, #tpu.memory_space<vmem>>, %arg3: memref<16x128xbf16, #tpu.memory_space<vmem>>, %arg4: memref<16x128xbf16, #tpu.memory_space<vmem>>, %arg5: memref<32x128xbf16, #tpu.memory_space<vmem>>, %arg6: memref<1x128xf32, #tpu.memory_space<vmem>>, %arg7: memref<32x16xbf16, #tpu.memory_space<vmem>>, %arg8: memref<1x16xf32, #tpu.memory_space<vmem>>, %arg9: memref<16x128xbf16, #tpu.memory_space<vmem>>, %arg10: memref<1x128xf32, #tpu.memory_space<vmem>>, %arg11: memref<8x128xf32, #tpu.memory_space<vmem>>) attributes {dimension_semantics = [], scalar_prefetch = 0 : i64, scratch_operands = 0 : i64, tpu.core_type = #tpu.core_type<tc>} {
    %c0 = arith.constant 0 : index
    %c0_0 = arith.constant 0 : index
    %0 = vector.load %arg2[%c0, %c0_0] : memref<64x16xbf16, #tpu.memory_space<vmem>>, vector<64x16xbf16>
    %c0_1 = arith.constant 0 : index
    %c0_2 = arith.constant 0 : index
    %1 = vector.load %arg0[%c0_1, %c0_2] : memref<8x64xbf16, #tpu.memory_space<vmem>>, vector<8x64xbf16>
    %cst = arith.constant dense<0.000000e+00> : vector<8x16xf32>
    %2 = tpu.matmul %1, %0, %cst {dimension_numbers = #tpu.dot_dimension_numbers<[1], [0], [0], [1], [0, 0, 1, 1], [], []>} : vector<8x64xbf16>, vector<64x16xbf16>, vector<8x16xf32> -> vector<8x16xf32>
    %cst_3 = arith.constant 2.500000e-01 : f32
    %3 = vector.broadcast %cst_3 : f32 to vector<8x16xf32>
    %4 = arith.mulf %2, %3 : vector<8x16xf32>
    %c0_4 = arith.constant 0 : index
    %c0_5 = arith.constant 0 : index
    %5 = vector.load %arg1[%c0_4, %c0_5] : memref<8x64xbf16, #tpu.memory_space<vmem>>, vector<8x64xbf16>
    %cst_6 = arith.constant dense<0.000000e+00> : vector<8x16xf32>
    %6 = tpu.matmul %5, %0, %cst_6 {dimension_numbers = #tpu.dot_dimension_numbers<[1], [0], [0], [1], [0, 0, 1, 1], [], []>} : vector<8x64xbf16>, vector<64x16xbf16>, vector<8x16xf32> -> vector<8x16xf32>
    %cst_7 = arith.constant 2.000000e-01 : f32
    %7 = vector.broadcast %cst_7 : f32 to vector<8x16xf32>
    %8 = arith.mulf %6, %7 : vector<8x16xf32>
    %9 = arith.truncf %4 : vector<8x16xf32> to vector<8x16xbf16>
    %c0_8 = arith.constant 0 : index
    %c0_9 = arith.constant 0 : index
    %10 = vector.load %arg3[%c0_8, %c0_9] : memref<16x128xbf16, #tpu.memory_space<vmem>>, vector<16x128xbf16>
    %cst_10 = arith.constant dense<0.000000e+00> : vector<8x128xf32>
    %11 = tpu.matmul %9, %10, %cst_10 {dimension_numbers = #tpu.dot_dimension_numbers<[1], [0], [0], [1], [0, 0, 1, 1], [], []>} : vector<8x16xbf16>, vector<16x128xbf16>, vector<8x128xf32> -> vector<8x128xf32>
    %12 = arith.truncf %8 : vector<8x16xf32> to vector<8x16xbf16>
    %c0_11 = arith.constant 0 : index
    %c0_12 = arith.constant 0 : index
    %13 = vector.load %arg4[%c0_11, %c0_12] : memref<16x128xbf16, #tpu.memory_space<vmem>>, vector<16x128xbf16>
    %cst_13 = arith.constant dense<0.000000e+00> : vector<8x128xf32>
    %14 = tpu.matmul %12, %13, %cst_13 {dimension_numbers = #tpu.dot_dimension_numbers<[1], [0], [0], [1], [0, 0, 1, 1], [], []>} : vector<8x16xbf16>, vector<16x128xbf16>, vector<8x128xf32> -> vector<8x128xf32>
    %15 = arith.addf %11, %14 : vector<8x128xf32>
    %c0_14 = arith.constant 0 : index
    %c0_15 = arith.constant 0 : index
    %16 = vector.load %arg6[%c0_14, %c0_15] : memref<1x128xf32, #tpu.memory_space<vmem>>, vector<1x128xf32>
    %17 = vector.broadcast %16 : vector<1x128xf32> to vector<8x128xf32>
    %18 = arith.addf %15, %17 : vector<8x128xf32>
    %c0_16 = arith.constant 0 : index
    %c0_17 = arith.constant 0 : index
    %19 = vector.load %arg5[%c0_16, %c0_17] : memref<32x128xbf16, #tpu.memory_space<vmem>>, vector<32x128xbf16>
    %cst_18 = arith.constant 0.000000e+00 : f32
    %20 = vector.broadcast %cst_18 : f32 to vector<1x32xf32>
    %cst_19 = arith.constant 0.000000e+00 : f32
    %21 = vector.broadcast %cst_19 : f32 to vector<1x32xf32>
    %22 = vector.extract_strided_slice %18 {offsets = [0, 0], sizes = [1, 128], strides = [1, 1]} : vector<8x128xf32> to vector<1x128xf32>
    %23 = arith.truncf %20 : vector<1x32xf32> to vector<1x32xbf16>
    %cst_20 = arith.constant dense<0.000000e+00> : vector<1x128xf32>
    %24 = tpu.matmul %23, %19, %cst_20 {dimension_numbers = #tpu.dot_dimension_numbers<[1], [0], [0], [1], [0, 0, 1, 1], [], []>} : vector<1x32xbf16>, vector<32x128xbf16>, vector<1x128xf32> -> vector<1x128xf32>
    %25 = arith.addf %22, %24 : vector<1x128xf32>
    %26 = arith.negf %25 : vector<1x128xf32>
    %27 = math.exp %26 : vector<1x128xf32>
    %cst_21 = arith.constant 1.000000e+00 : f32
    %28 = vector.broadcast %cst_21 : f32 to vector<1x128xf32>
    %29 = arith.addf %28, %27 : vector<1x128xf32>
    %30 = arith.divf %28, %29 : vector<1x128xf32>
    %31 = vector.extract_strided_slice %30 {offsets = [0, 0], sizes = [1, 32], strides = [1, 1]} : vector<1x128xf32> to vector<1x32xf32>
    %32 = vector.extract_strided_slice %30 {offsets = [0, 32], sizes = [1, 32], strides = [1, 1]} : vector<1x128xf32> to vector<1x32xf32>
    %33 = vector.extract_strided_slice %30 {offsets = [0, 96], sizes = [1, 32], strides = [1, 1]} : vector<1x128xf32> to vector<1x32xf32>
    %34 = vector.extract_strided_slice %25 {offsets = [0, 64], sizes = [1, 32], strides = [1, 1]} : vector<1x128xf32> to vector<1x32xf32>
    %35 = math.tanh %34 : vector<1x32xf32>
    %36 = arith.mulf %32, %21 : vector<1x32xf32>
    %37 = arith.mulf %31, %35 : vector<1x32xf32>
    %38 = arith.addf %36, %37 : vector<1x32xf32>
    %39 = math.tanh %38 : vector<1x32xf32>
    %40 = arith.mulf %33, %39 : vector<1x32xf32>
    %41 = vector.extract_strided_slice %18 {offsets = [1, 0], sizes = [1, 128], strides = [1, 1]} : vector<8x128xf32> to vector<1x128xf32>
    %42 = arith.truncf %40 : vector<1x32xf32> to vector<1x32xbf16>
    %cst_22 = arith.constant dense<0.000000e+00> : vector<1x128xf32>
    %43 = tpu.matmul %42, %19, %cst_22 {dimension_numbers = #tpu.dot_dimension_numbers<[1], [0], [0], [1], [0, 0, 1, 1], [], []>} : vector<1x32xbf16>, vector<32x128xbf16>, vector<1x128xf32> -> vector<1x128xf32>
    %44 = arith.addf %41, %43 : vector<1x128xf32>
    %45 = arith.negf %44 : vector<1x128xf32>
    %46 = math.exp %45 : vector<1x128xf32>
    %cst_23 = arith.constant 1.000000e+00 : f32
    %47 = vector.broadcast %cst_23 : f32 to vector<1x128xf32>
    %48 = arith.addf %47, %46 : vector<1x128xf32>
    %49 = arith.divf %47, %48 : vector<1x128xf32>
    %50 = vector.extract_strided_slice %49 {offsets = [0, 0], sizes = [1, 32], strides = [1, 1]} : vector<1x128xf32> to vector<1x32xf32>
    %51 = vector.extract_strided_slice %49 {offsets = [0, 32], sizes = [1, 32], strides = [1, 1]} : vector<1x128xf32> to vector<1x32xf32>
    %52 = vector.extract_strided_slice %49 {offsets = [0, 96], sizes = [1, 32], strides = [1, 1]} : vector<1x128xf32> to vector<1x32xf32>
    %53 = vector.extract_strided_slice %44 {offsets = [0, 64], sizes = [1, 32], strides = [1, 1]} : vector<1x128xf32> to vector<1x32xf32>
    %54 = math.tanh %53 : vector<1x32xf32>
    %55 = arith.mulf %51, %38 : vector<1x32xf32>
    %56 = arith.mulf %50, %54 : vector<1x32xf32>
    %57 = arith.addf %55, %56 : vector<1x32xf32>
    %58 = math.tanh %57 : vector<1x32xf32>
    %59 = arith.mulf %52, %58 : vector<1x32xf32>
    %60 = vector.extract_strided_slice %18 {offsets = [2, 0], sizes = [1, 128], strides = [1, 1]} : vector<8x128xf32> to vector<1x128xf32>
    %61 = arith.truncf %59 : vector<1x32xf32> to vector<1x32xbf16>
    %cst_24 = arith.constant dense<0.000000e+00> : vector<1x128xf32>
    %62 = tpu.matmul %61, %19, %cst_24 {dimension_numbers = #tpu.dot_dimension_numbers<[1], [0], [0], [1], [0, 0, 1, 1], [], []>} : vector<1x32xbf16>, vector<32x128xbf16>, vector<1x128xf32> -> vector<1x128xf32>
    %63 = arith.addf %60, %62 : vector<1x128xf32>
    %64 = arith.negf %63 : vector<1x128xf32>
    %65 = math.exp %64 : vector<1x128xf32>
    %cst_25 = arith.constant 1.000000e+00 : f32
    %66 = vector.broadcast %cst_25 : f32 to vector<1x128xf32>
    %67 = arith.addf %66, %65 : vector<1x128xf32>
    %68 = arith.divf %66, %67 : vector<1x128xf32>
    %69 = vector.extract_strided_slice %68 {offsets = [0, 0], sizes = [1, 32], strides = [1, 1]} : vector<1x128xf32> to vector<1x32xf32>
    %70 = vector.extract_strided_slice %68 {offsets = [0, 32], sizes = [1, 32], strides = [1, 1]} : vector<1x128xf32> to vector<1x32xf32>
    %71 = vector.extract_strided_slice %68 {offsets = [0, 96], sizes = [1, 32], strides = [1, 1]} : vector<1x128xf32> to vector<1x32xf32>
    %72 = vector.extract_strided_slice %63 {offsets = [0, 64], sizes = [1, 32], strides = [1, 1]} : vector<1x128xf32> to vector<1x32xf32>
    %73 = math.tanh %72 : vector<1x32xf32>
    %74 = arith.mulf %70, %57 : vector<1x32xf32>
    %75 = arith.mulf %69, %73 : vector<1x32xf32>
    %76 = arith.addf %74, %75 : vector<1x32xf32>
    %77 = math.tanh %76 : vector<1x32xf32>
    %78 = arith.mulf %71, %77 : vector<1x32xf32>
    %79 = vector.extract_strided_slice %18 {offsets = [3, 0], sizes = [1, 128], strides = [1, 1]} : vector<8x128xf32> to vector<1x128xf32>
    %80 = arith.truncf %78 : vector<1x32xf32> to vector<1x32xbf16>
    %cst_26 = arith.constant dense<0.000000e+00> : vector<1x128xf32>
    %81 = tpu.matmul %80, %19, %cst_26 {dimension_numbers = #tpu.dot_dimension_numbers<[1], [0], [0], [1], [0, 0, 1, 1], [], []>} : vector<1x32xbf16>, vector<32x128xbf16>, vector<1x128xf32> -> vector<1x128xf32>
    %82 = arith.addf %79, %81 : vector<1x128xf32>
    %83 = arith.negf %82 : vector<1x128xf32>
    %84 = math.exp %83 : vector<1x128xf32>
    %cst_27 = arith.constant 1.000000e+00 : f32
    %85 = vector.broadcast %cst_27 : f32 to vector<1x128xf32>
    %86 = arith.addf %85, %84 : vector<1x128xf32>
    %87 = arith.divf %85, %86 : vector<1x128xf32>
    %88 = vector.extract_strided_slice %87 {offsets = [0, 0], sizes = [1, 32], strides = [1, 1]} : vector<1x128xf32> to vector<1x32xf32>
    %89 = vector.extract_strided_slice %87 {offsets = [0, 32], sizes = [1, 32], strides = [1, 1]} : vector<1x128xf32> to vector<1x32xf32>
    %90 = vector.extract_strided_slice %87 {offsets = [0, 96], sizes = [1, 32], strides = [1, 1]} : vector<1x128xf32> to vector<1x32xf32>
    %91 = vector.extract_strided_slice %82 {offsets = [0, 64], sizes = [1, 32], strides = [1, 1]} : vector<1x128xf32> to vector<1x32xf32>
    %92 = math.tanh %91 : vector<1x32xf32>
    %93 = arith.mulf %89, %76 : vector<1x32xf32>
    %94 = arith.mulf %88, %92 : vector<1x32xf32>
    %95 = arith.addf %93, %94 : vector<1x32xf32>
    %96 = math.tanh %95 : vector<1x32xf32>
    %97 = arith.mulf %90, %96 : vector<1x32xf32>
    %98 = vector.extract_strided_slice %18 {offsets = [4, 0], sizes = [1, 128], strides = [1, 1]} : vector<8x128xf32> to vector<1x128xf32>
    %99 = arith.truncf %97 : vector<1x32xf32> to vector<1x32xbf16>
    %cst_28 = arith.constant dense<0.000000e+00> : vector<1x128xf32>
    %100 = tpu.matmul %99, %19, %cst_28 {dimension_numbers = #tpu.dot_dimension_numbers<[1], [0], [0], [1], [0, 0, 1, 1], [], []>} : vector<1x32xbf16>, vector<32x128xbf16>, vector<1x128xf32> -> vector<1x128xf32>
    %101 = arith.addf %98, %100 : vector<1x128xf32>
    %102 = arith.negf %101 : vector<1x128xf32>
    %103 = math.exp %102 : vector<1x128xf32>
    %cst_29 = arith.constant 1.000000e+00 : f32
    %104 = vector.broadcast %cst_29 : f32 to vector<1x128xf32>
    %105 = arith.addf %104, %103 : vector<1x128xf32>
    %106 = arith.divf %104, %105 : vector<1x128xf32>
    %107 = vector.extract_strided_slice %106 {offsets = [0, 0], sizes = [1, 32], strides = [1, 1]} : vector<1x128xf32> to vector<1x32xf32>
    %108 = vector.extract_strided_slice %106 {offsets = [0, 32], sizes = [1, 32], strides = [1, 1]} : vector<1x128xf32> to vector<1x32xf32>
    %109 = vector.extract_strided_slice %106 {offsets = [0, 96], sizes = [1, 32], strides = [1, 1]} : vector<1x128xf32> to vector<1x32xf32>
    %110 = vector.extract_strided_slice %101 {offsets = [0, 64], sizes = [1, 32], strides = [1, 1]} : vector<1x128xf32> to vector<1x32xf32>
    %111 = math.tanh %110 : vector<1x32xf32>
    %112 = arith.mulf %108, %95 : vector<1x32xf32>
    %113 = arith.mulf %107, %111 : vector<1x32xf32>
    %114 = arith.addf %112, %113 : vector<1x32xf32>
    %115 = math.tanh %114 : vector<1x32xf32>
    %116 = arith.mulf %109, %115 : vector<1x32xf32>
    %117 = vector.extract_strided_slice %18 {offsets = [5, 0], sizes = [1, 128], strides = [1, 1]} : vector<8x128xf32> to vector<1x128xf32>
    %118 = arith.truncf %116 : vector<1x32xf32> to vector<1x32xbf16>
    %cst_30 = arith.constant dense<0.000000e+00> : vector<1x128xf32>
    %119 = tpu.matmul %118, %19, %cst_30 {dimension_numbers = #tpu.dot_dimension_numbers<[1], [0], [0], [1], [0, 0, 1, 1], [], []>} : vector<1x32xbf16>, vector<32x128xbf16>, vector<1x128xf32> -> vector<1x128xf32>
    %120 = arith.addf %117, %119 : vector<1x128xf32>
    %121 = arith.negf %120 : vector<1x128xf32>
    %122 = math.exp %121 : vector<1x128xf32>
    %cst_31 = arith.constant 1.000000e+00 : f32
    %123 = vector.broadcast %cst_31 : f32 to vector<1x128xf32>
    %124 = arith.addf %123, %122 : vector<1x128xf32>
    %125 = arith.divf %123, %124 : vector<1x128xf32>
    %126 = vector.extract_strided_slice %125 {offsets = [0, 0], sizes = [1, 32], strides = [1, 1]} : vector<1x128xf32> to vector<1x32xf32>
    %127 = vector.extract_strided_slice %125 {offsets = [0, 32], sizes = [1, 32], strides = [1, 1]} : vector<1x128xf32> to vector<1x32xf32>
    %128 = vector.extract_strided_slice %125 {offsets = [0, 96], sizes = [1, 32], strides = [1, 1]} : vector<1x128xf32> to vector<1x32xf32>
    %129 = vector.extract_strided_slice %120 {offsets = [0, 64], sizes = [1, 32], strides = [1, 1]} : vector<1x128xf32> to vector<1x32xf32>
    %130 = math.tanh %129 : vector<1x32xf32>
    %131 = arith.mulf %127, %114 : vector<1x32xf32>
    %132 = arith.mulf %126, %130 : vector<1x32xf32>
    %133 = arith.addf %131, %132 : vector<1x32xf32>
    %134 = math.tanh %133 : vector<1x32xf32>
    %135 = arith.mulf %128, %134 : vector<1x32xf32>
    %136 = vector.extract_strided_slice %18 {offsets = [6, 0], sizes = [1, 128], strides = [1, 1]} : vector<8x128xf32> to vector<1x128xf32>
    %137 = arith.truncf %135 : vector<1x32xf32> to vector<1x32xbf16>
    %cst_32 = arith.constant dense<0.000000e+00> : vector<1x128xf32>
    %138 = tpu.matmul %137, %19, %cst_32 {dimension_numbers = #tpu.dot_dimension_numbers<[1], [0], [0], [1], [0, 0, 1, 1], [], []>} : vector<1x32xbf16>, vector<32x128xbf16>, vector<1x128xf32> -> vector<1x128xf32>
    %139 = arith.addf %136, %138 : vector<1x128xf32>
    %140 = arith.negf %139 : vector<1x128xf32>
    %141 = math.exp %140 : vector<1x128xf32>
    %cst_33 = arith.constant 1.000000e+00 : f32
    %142 = vector.broadcast %cst_33 : f32 to vector<1x128xf32>
    %143 = arith.addf %142, %141 : vector<1x128xf32>
    %144 = arith.divf %142, %143 : vector<1x128xf32>
    %145 = vector.extract_strided_slice %144 {offsets = [0, 0], sizes = [1, 32], strides = [1, 1]} : vector<1x128xf32> to vector<1x32xf32>
    %146 = vector.extract_strided_slice %144 {offsets = [0, 32], sizes = [1, 32], strides = [1, 1]} : vector<1x128xf32> to vector<1x32xf32>
    %147 = vector.extract_strided_slice %144 {offsets = [0, 96], sizes = [1, 32], strides = [1, 1]} : vector<1x128xf32> to vector<1x32xf32>
    %148 = vector.extract_strided_slice %139 {offsets = [0, 64], sizes = [1, 32], strides = [1, 1]} : vector<1x128xf32> to vector<1x32xf32>
    %149 = math.tanh %148 : vector<1x32xf32>
    %150 = arith.mulf %146, %133 : vector<1x32xf32>
    %151 = arith.mulf %145, %149 : vector<1x32xf32>
    %152 = arith.addf %150, %151 : vector<1x32xf32>
    %153 = math.tanh %152 : vector<1x32xf32>
    %154 = arith.mulf %147, %153 : vector<1x32xf32>
    %155 = vector.extract_strided_slice %18 {offsets = [7, 0], sizes = [1, 128], strides = [1, 1]} : vector<8x128xf32> to vector<1x128xf32>
    %156 = arith.truncf %154 : vector<1x32xf32> to vector<1x32xbf16>
    %cst_34 = arith.constant dense<0.000000e+00> : vector<1x128xf32>
    %157 = tpu.matmul %156, %19, %cst_34 {dimension_numbers = #tpu.dot_dimension_numbers<[1], [0], [0], [1], [0, 0, 1, 1], [], []>} : vector<1x32xbf16>, vector<32x128xbf16>, vector<1x128xf32> -> vector<1x128xf32>
    %158 = arith.addf %155, %157 : vector<1x128xf32>
    %159 = arith.negf %158 : vector<1x128xf32>
    %160 = math.exp %159 : vector<1x128xf32>
    %cst_35 = arith.constant 1.000000e+00 : f32
    %161 = vector.broadcast %cst_35 : f32 to vector<1x128xf32>
    %162 = arith.addf %161, %160 : vector<1x128xf32>
    %163 = arith.divf %161, %162 : vector<1x128xf32>
    %164 = vector.extract_strided_slice %163 {offsets = [0, 0], sizes = [1, 32], strides = [1, 1]} : vector<1x128xf32> to vector<1x32xf32>
    %165 = vector.extract_strided_slice %163 {offsets = [0, 32], sizes = [1, 32], strides = [1, 1]} : vector<1x128xf32> to vector<1x32xf32>
    %166 = vector.extract_strided_slice %163 {offsets = [0, 96], sizes = [1, 32], strides = [1, 1]} : vector<1x128xf32> to vector<1x32xf32>
    %167 = vector.extract_strided_slice %158 {offsets = [0, 64], sizes = [1, 32], strides = [1, 1]} : vector<1x128xf32> to vector<1x32xf32>
    %168 = math.tanh %167 : vector<1x32xf32>
    %169 = arith.mulf %165, %152 : vector<1x32xf32>
    %170 = arith.mulf %164, %168 : vector<1x32xf32>
    %171 = arith.addf %169, %170 : vector<1x32xf32>
    %172 = math.tanh %171 : vector<1x32xf32>
    %173 = arith.mulf %166, %172 : vector<1x32xf32>
    %174 = tpu.concatenate %40, %59, %78, %97, %116, %135, %154, %173 in 0 : vector<1x32xf32>, vector<1x32xf32>, vector<1x32xf32>, vector<1x32xf32>, vector<1x32xf32>, vector<1x32xf32>, vector<1x32xf32>, vector<1x32xf32> -> vector<8x32xf32>
    %175 = arith.truncf %174 : vector<8x32xf32> to vector<8x32xbf16>
    %c0_36 = arith.constant 0 : index
    %c0_37 = arith.constant 0 : index
    %176 = vector.load %arg7[%c0_36, %c0_37] : memref<32x16xbf16, #tpu.memory_space<vmem>>, vector<32x16xbf16>
    %cst_38 = arith.constant dense<0.000000e+00> : vector<8x16xf32>
    %177 = tpu.matmul %175, %176, %cst_38 {dimension_numbers = #tpu.dot_dimension_numbers<[1], [0], [0], [1], [0, 0, 1, 1], [], []>} : vector<8x32xbf16>, vector<32x16xbf16>, vector<8x16xf32> -> vector<8x16xf32>
    %c0_39 = arith.constant 0 : index
    %c0_40 = arith.constant 0 : index
    %178 = vector.load %arg8[%c0_39, %c0_40] : memref<1x16xf32, #tpu.memory_space<vmem>>, vector<1x16xf32>
    %179 = vector.broadcast %178 : vector<1x16xf32> to vector<8x16xf32>
    %180 = arith.addf %177, %179 : vector<8x16xf32>
    %cst_41 = arith.constant 0.000000e+00 : f32
    %181 = vector.broadcast %cst_41 : f32 to vector<8x16xf32>
    %182 = arith.maximumf %180, %181 : vector<8x16xf32>
    %183 = arith.truncf %182 : vector<8x16xf32> to vector<8x16xbf16>
    %c0_42 = arith.constant 0 : index
    %c0_43 = arith.constant 0 : index
    %184 = vector.load %arg9[%c0_42, %c0_43] : memref<16x128xbf16, #tpu.memory_space<vmem>>, vector<16x128xbf16>
    %cst_44 = arith.constant dense<0.000000e+00> : vector<8x128xf32>
    %185 = tpu.matmul %183, %184, %cst_44 {dimension_numbers = #tpu.dot_dimension_numbers<[1], [0], [0], [1], [0, 0, 1, 1], [], []>} : vector<8x16xbf16>, vector<16x128xbf16>, vector<8x128xf32> -> vector<8x128xf32>
    %c0_45 = arith.constant 0 : index
    %c0_46 = arith.constant 0 : index
    %186 = vector.load %arg10[%c0_45, %c0_46] : memref<1x128xf32, #tpu.memory_space<vmem>>, vector<1x128xf32>
    %187 = vector.broadcast %186 : vector<1x128xf32> to vector<8x128xf32>
    %188 = arith.addf %185, %187 : vector<8x128xf32>
    %c0_47 = arith.constant 0 : index
    %c0_48 = arith.constant 0 : index
    %189 = vector.load %arg11[%c0_47, %c0_48] : memref<8x128xf32, #tpu.memory_space<vmem>>, vector<8x128xf32>
    tpu.vector_store %arg11[%c0_47, %c0_48], %188 {strides = array<i32>} : memref<8x128xf32, #tpu.memory_space<vmem>>, vector<8x128xf32>,
    return
  }
}

</mosaic_0001>

<bundles_post_ra>
// kernel: eq.1
= control target key start
LH: loop header
LB: loop body
LE: loop exit
PB: predicated region body
PF: predicated region fallthrough
CT: control target
= control target key end

     0   :  { %2 = vsyncpa [#allocation1], 0  ;;  %s69_s8 = smov [#allocation0]   ;;  %s92_s0 = inlined_call_operand.hbm [shape: s32[8,3,4], index: 0, kind: input, shape index: {}]   ;;  %s93_s1 = inlined_call_operand.vmem [shape: s32[8,12], index: 1, kind: output, shape index: {}]  }
   0x1   :  { %s6_s0 = sshll.u32 %s92_s0, 4  ;;  %s8_s9 = sshll.u32 %s69_s8, 4  ;;  %s7_s0 = int_to_ptr.hbm [resolvable:$true] %s6_s0  ;;  %s9_s9 = int_to_ptr.vmem [resolvable:$true] %s8_s9 }
   0x2   :  { %11 = dma.hbm_to_vmem [thread:$0]  %s7_s0, 192, %s9_s9, [#allocation1]  }
   0x3   :  { %67 = dma.done.wait [#allocation1], 192  }
   0x4   :  { %68 = vsyncadd [#allocation1], 4294967104  ;;  %v17_v0 = vld [vmem:[#allocation0 + $0x8] sm:$0xf]  ;;  %v21_v1 = vld [vmem:[#allocation0 + $0x4] sm:$0xf] }
   0x5   :  { %v24_v2 = vld [vmem:[#allocation0] sm:$0xf]  ;;  %19 = vst [vmem:[#allocation2] sm:$0xf] %v17_v0  ;;  %vm27_vm0 = vcmask 64512  }
   0x6   :  { %23 = vst [vmem:[#allocation2 + $0x10] sm:$0xf] %v21_v1 }
   0x7   :  { %25 = vst [vmem:[#allocation2 + $0x8] sm:$0xf] %v24_v2 }
   0xc   :  { %v35_v3 = vld [vmem:[#allocation2] sm:$0xf]  }
   0xd   :  { %v30_v4 = vld [vmem:[#allocation2 + $0x10] sm:$0xf]   ;;  %41 = vst.msk [vmem:[%s93_s1 + $0x8] sm:$0xf] %vm27_vm0, %v35_v3  }
   0xe   :  { %v26_v5 = vld [vmem:[#allocation2 + $0x8] sm:$0xf]   ;;  %40 = vst.msk [vmem:[%s93_s1 + $0x4] sm:$0xf] %vm27_vm0, %v30_v4  }
   0xf   :  { %28 = vst.msk [vmem:[%s93_s1] sm:$0xf] %vm27_vm0, %v26_v5  }
  0x10   :  { %39 = vsyncpa [#allocation1], 1 }

// kernel: embedded_set_lstm_forward.1
= control target key start
LH: loop header
LB: loop body
LE: loop exit
PB: predicated region body
PF: predicated region fallthrough
CT: control target
= control target key end

     0   :  { %s1142_s0 = inlined_call_operand.vmem [shape: bf16[8,64], index: 0, kind: input, shape index: {}]   ;;  %s1143_s1 = inlined_call_operand.vmem [shape: bf16[8,64], index: 1, kind: input, shape index: {}]   ;;  %s1144_s2 = inlined_call_operand.vmem [shape: bf16[64,16], index: 2, kind: input, shape index: {}]   ;;  %s1145_s3 = inlined_call_operand.vmem [shape: bf16[16,128], index: 3, kind: input, shape index: {}]   ;;  %s1146_s4 = inlined_call_operand.vmem [shape: bf16[16,128], index: 4, kind: input, shape index: {}]   ;;  %s1147_s5 = inlined_call_operand.vmem [shape: bf16[32,128], index: 5, kind: input, shape index: {}]   ;;  %s1148_s6 = inlined_call_operand.vmem [shape: f32[1,128], index: 6, kind: input, shape index: {}]   ;;  %s1149_s7 = inlined_call_operand.vmem [shape: bf16[32,16], index: 7, kind: input, shape index: {}]   ;;  %s1150_s8 = inlined_call_operand.vmem [shape: f32[1,16], index: 8, kind: input, shape index: {}]   ;;  %s1151_s9 = inlined_call_operand.vmem [shape: bf16[16,128], index: 9, kind: input, shape index: {}]   ;;  %s1152_s10 = inlined_call_operand.vmem [shape: f32[1,128], index: 10, kind: input, shape index: {}]   ;;  %s1153_s11 = inlined_call_operand.hbm [shape: f32[8,128], index: 11, kind: output, shape index: {}]  }
   0x1   :  { %v864_v0 = vld [vmem:[%s1144_s2 + $0x18] sm:$0xff]  ;;  %v863_v1 = vld [vmem:[%s1144_s2 + $0x10] sm:$0xff] }
   0x2   :  { %81 = vmatpush.bf16.msra.mxu0 %v864_v0  ;;  %99 = vmatpush.bf16.msra.mxu1 %v864_v0 }
   0x3   :  { %16 = vsyncpa [#allocation3], 0  ;;  %v862_v2 = vld [vmem:[%s1144_s2 + $0x8] sm:$0xff]  ;;  %v861_v3 = vld [vmem:[%s1144_s2] sm:$0xff]  ;;  %vm73_vm0 = vcmask 523264   ;;  %vm121_vm1 = vcmask 130048  }
   0x4   :  { %v48_v4 = vld [vmem:[%s1142_s0] sm:$0xf]  ;;  %v868_v8 = vld [vmem:[%s1147_s5 + $0x8] sm:$0xff]  ;;  %v969_v18 = vmov 0   ;;  %vm181_vm6 = vcmask 261120   ;;  %vm695_vm15 = vcmask 1040384  }
   0x5   :  { %v91_v5 = vld [vmem:[%s1143_s1] sm:$0xf]  ;;  %s787_s27 = sshll.u32 %s1153_s11, 4  ;;  %s788_s27 = int_to_ptr.hbm [resolvable:$true] %s787_s27 }
   0x6   :  { %82 = vmatpush.bf16.msra.mxu0 %v863_v1  ;;  %100 = vmatpush.bf16.msra.mxu1 %v863_v1  ;;  %v866_v6 = vld [vmem:[%s1146_s4] sm:$0xff] }
   0x7   :  { %v865_v7 = vld [vmem:[%s1145_s3] sm:$0xff]  ;;  %132 = vmatpush.bf16.msra.mxu2 %v866_v6 }
   0x8   :  { %154 = vmatpush.bf16.msra.mxu3 %v865_v7  ;;  %v867_v9 = vld [vmem:[%s1147_s5] sm:$0xff]  ;;  %s970_s5 = smov 64  }
   0x9   :  { %v876_v24 = vld [vmem:[%s1148_s6] ss:$0 sm:$0xff]  ;;  %s971_s6 = smov 32  }
   0xa   :  { %83 = vmatpush.bf16.msra.mxu0 %v862_v2  ;;  %101 = vmatpush.bf16.msra.mxu1 %v862_v2 }
   0xb   :  { %191 = vmatpush.bf16.msrb.mxu2 %v868_v8 }
   0xc   :  { %249 = vmatpush.bf16.msrb.mxu3 %v868_v8 }
   0xe   :  { %84 = vmatpush.bf16.msra.mxu0 %v861_v3  ;;  %102 = vmatpush.bf16.msra.mxu1 %v861_v3 }
   0xf   :  { %192 = vmatpush.bf16.msrb.mxu2 %v867_v9 }
  0x10   :  { %250 = vmatpush.bf16.msrb.mxu3 %v867_v9 }
  0x11   :  { %812 = vmatmul.msk.bf16.vlgmr.msra.gmra.mxu0 %vm73_vm0, %v48_v4  ;;  %813 = vmatmul.msk.bf16.vlgmr.msra.gmra.mxu1 %vm73_vm0, %v91_v5  ;;  %vm697_vm0 = vcmask 1041408  }
  0x12   :  { %315 = vmatpush.bf16.msrb.mxu0 %v868_v8  ;;  %380 = vmatpush.bf16.msrb.mxu1 %v868_v8 }
  0x16   :  { %316 = vmatpush.bf16.msrb.mxu0 %v867_v9  ;;  %381 = vmatpush.bf16.msrb.mxu1 %v867_v9 }
  0x1a   :  { %579 = vmatpush.bf16.msra.mxu0 %v868_v8  ;;  %644 = vmatpush.bf16.msra.mxu1 %v868_v8 }
  0x1e   :  { %580 = vmatpush.bf16.msra.mxu0 %v867_v9  ;;  %645 = vmatpush.bf16.msra.mxu1 %v867_v9 }
  0x8e   :  { %v86_v10 = vpop.f32.mrf.mxu0  ;;  %v104_v11 = vpop.f32.mrf.mxu1 }
  0x8f   :  { %v90_v12 = vmul.f32 0.25, %v86_v10  ;;  %v108_v13 = vmul.f32 0.2, %v104_v11 }
  0x91   :  { %v109_v14 = vpack.c.bf16 %v90_v12, %v90_v12  ;;  %v112_v15 = vpack.c.bf16 %v108_v13, %v108_v13 }
  0x93   :  { %818 = vmatmul.msk.bf16.vlgmr.msra.gmra.mxu2 %vm121_vm1, %v112_v15  ;;  %823 = vmatmul.msk.bf16.vlgmr.msra.gmra.mxu3 %vm121_vm1, %v109_v14 }
  0x94   :  { %447 = vmatpush.bf16.msra.mxu2 %v868_v8  ;;  %512 = vmatpush.bf16.msra.mxu3 %v868_v8 }
  0x96   :  { %v106_v16 = vpop.f32.mrf.mxu1  ;;  %v88_v17 = vpop.f32.mrf.mxu0 }
  0x98   :  { %448 = vmatpush.bf16.msra.mxu2 %v867_v9  ;;  %513 = vmatpush.bf16.msra.mxu3 %v867_v9 }
  0xa3   :  { %193 = vmatmul.bf16.vlgmr.msrb.gmra.mxu2 %v969_v18 }
 0x116   :  { %v134_v19 = vpop.f32.mrf.mxu2  ;;  %v156_v20 = vpop.f32.mrf.mxu3 }
 0x117   :  { %v157_v23 = vadd.f32 %v156_v20, %v134_v19 }
 0x119   :  { %v1068_v25 = vadd.f32 %v876_v24, %v157_v23 }
 0x11e   :  { %v136_v21 = vpop.f32.mrf.mxu2  ;;  %v158_v22 = vpop.f32.mrf.mxu3 }
 0x126   :  { %v194_v26 = vpop.f32.mrf.mxu2 }
 0x127   :  { %v198_v27 = vadd.f32 %v194_v26, %v1068_v25 }
 0x129   :  { %879 = vtanh.f32 %v198_v27  ;;  %v832_v30 = vmul.f32 -1.442695, %v198_v27 }
 0x12b   :  { %881 = vpow2.f32 %v832_v30 }
 0x12e   :  { %v196_v28 = vpop.f32.mrf.mxu2 }
 0x12f   :  { %v880_v29 = vpop.eup %879 }
 0x130   :  { %221 = vrot.lane.b32.xlu0 %v880_v29, %s970_s5 }
 0x131   :  { %v882_v31 = vpop.eup %881 }
 0x132   :  { %v202_v32 = vadd.f32 1.0, %v882_v31 }
 0x134   :  { %883 = vrcp.f32 %v202_v32  ;;  %v214_v38 = vand.u32 2147483648, %v202_v32  ;;  %vm208_vm3 = vweird.f32 %v202_v32  ;;  %v212_v39 = vand.u32 2147483647, %v202_v32 }
 0x136   :  { %v215_v41 = vor.u32 1.1754944e-38, %v214_v38  ;;  %vm213_vm5 = vcmp.eq.f32.partialorder %v212_v39, 8.507059e+37 }
 0x13a   :  { %v884_v33 = vpop.eup %883 }
 0x13b   :  { %v204_v34 = vmul.f32 %v884_v33, %v202_v32  ;;  %vm209_vm2 = vweird.f32 %v884_v33 }
 0x13c   :  { %vm210_vm4 = vmor %vm208_vm3, %vm209_vm2 }
 0x13d   :  { %v205_v35 = vsub.f32 1.0, %v204_v34 }
 0x13f   :  { %v206_v36 = vmul.f32 %v884_v33, %v205_v35 }
 0x141   :  { %v207_v37 = vadd.f32 %v884_v33, %v206_v36 }
 0x143   :  { %v211_v40 = vsel %vm210_vm4, %v884_v33, %v207_v37 }
 0x144   :  { %v216_v43 = vsel %vm213_vm5, %v215_v41, %v211_v40 }
 0x145   :  { %v219_v45 = vmul.f32 0.0, %v216_v43 }
 0x1a2   :  { %v222_v42 = vpop.permute.xlu0 %221 }
 0x1a3   :  { %v224_v44 = vmul.f32 %v222_v42, %v216_v43 }
 0x1a5   :  { %226 = vrot.lane.b32.xlu0 %v224_v44, %s971_s6 }
 0x217   :  { %v227_v46 = vpop.permute.xlu0 %226 }
 0x218   :  { %v229_v47 = vadd.f32 %v227_v46, %v219_v45 }
 0x21a   :  { %885 = vtanh.f32 %v229_v47  ;;  %v281_v9 = vrot.slane %v229_v47, 7 }
 0x220   :  { %v886_v48 = vpop.eup %885 }
 0x221   :  { %232 = vrot.lane.b32.xlu1 %v886_v48, %s970_s5 }
 0x293   :  { %v233_v49 = vpop.permute.xlu1 %232 }
 0x294   :  { %v1074_v50 = vmul.f32 %v233_v49, %v216_v43 }
 0x296   :  { %v236_v51 = vpack.c.bf16 %v1074_v50, %v1074_v50 }
 0x298   :  { %238 = vrot.lane.b32.xlu1 %v236_v51, %s971_s6 }
 0x30a   :  { %v239_v52 = vpop.permute.xlu1 %238 }
 0x30b   :  { %833 = vmatmul.msk.bf16.vlgmr.msrb.gmra.mxu3 %vm181_vm6, %v239_v52 }
 0x38e   :  { %v252_v53 = vpop.f32.mrf.mxu3 }
 0x38f   :  { %v257_v54 = vrot.slane %v252_v53, 7 }
 0x391   :  { %v259_v55 = vadd.f32 %v257_v54, %v1068_v25 }
 0x393   :  { %887 = vtanh.f32 %v259_v55  ;;  %v834_v58 = vmul.f32 -1.442695, %v259_v55 }
 0x395   :  { %889 = vpow2.f32 %v834_v58 }
 0x396   :  { %v254_v56 = vpop.f32.mrf.mxu3 }
 0x399   :  { %v888_v57 = vpop.eup %887 }
 0x39a   :  { %285 = vrot.lane.b32.xlu2 %v888_v57, %s970_s5 }
 0x39b   :  { %v890_v59 = vpop.eup %889 }
 0x39c   :  { %v263_v60 = vadd.f32 1.0, %v890_v59 }
 0x39e   :  { %891 = vrcp.f32 %v263_v60  ;;  %v275_v2 = vand.u32 2147483648, %v263_v60  ;;  %vm269_vm8 = vweird.f32 %v263_v60  ;;  %v273_v3 = vand.u32 2147483647, %v263_v60 }
 0x3a0   :  { %v276_v5 = vor.u32 1.1754944e-38, %v275_v2  ;;  %vm274_vm10 = vcmp.eq.f32.partialorder %v273_v3, 8.507059e+37 }
 0x3a4   :  { %v892_v61 = vpop.eup %891 }
 0x3a5   :  { %v265_v62 = vmul.f32 %v892_v61, %v263_v60  ;;  %vm270_vm7 = vweird.f32 %v892_v61 }
 0x3a6   :  { %vm271_vm9 = vmor %vm269_vm8, %vm270_vm7  ;;  %vm699_vm7 = vcmask 1042432  }
 0x3a7   :  { %v266_v63 = vsub.f32 1.0, %v265_v62 }
 0x3a9   :  { %v267_v0 = vmul.f32 %v892_v61, %v266_v63 }
 0x3ab   :  { %v268_v1 = vadd.f32 %v892_v61, %v267_v0 }
 0x3ad   :  { %v272_v4 = vsel %vm271_vm9, %v892_v61, %v268_v1 }
 0x3ae   :  { %v277_v7 = vsel %vm274_vm10, %v276_v5, %v272_v4 }
 0x3af   :  { %v283_v10 = vmul.f32 %v281_v9, %v277_v7 }
 0x3f4   :  { %v286_v6 = vpop.permute.xlu2 %285 }
 0x3f5   :  { %v288_v8 = vmul.f32 %v286_v6, %v277_v7 }
 0x3f7   :  { %290 = vrot.lane.b32.xlu2 %v288_v8, %s971_s6 }
 0x451   :  { %v291_v11 = vpop.permute.xlu2 %290 }
 0x452   :  { %v293_v12 = vadd.f32 %v291_v11, %v283_v10 }
 0x454   :  { %893 = vtanh.f32 %v293_v12  ;;  %v347_v40 = vrot.slane %v293_v12, 7 }
 0x45a   :  { %v894_v13 = vpop.eup %893 }
 0x45b   :  { %296 = vrot.lane.b32.xlu0 %v894_v13, %s970_s5 }
 0x4cd   :  { %v297_v14 = vpop.permute.xlu0 %296 }
 0x4ce   :  { %v299_v15 = vmul.f32 %v297_v14, %v277_v7 }
 0x4d0   :  { %v300_v16 = vpack.c.bf16 %v299_v15, %v299_v15  ;;  %v696_v47 = vsel %vm695_vm15, %v1074_v50, %v299_v15 }
 0x4d2   :  { %v302_v17 = vshrl.u32 %v300_v16, 16 }
 0x4d4   :  { %304 = vrot.lane.b32.xlu1 %v302_v17, %s971_s6 }
 0x546   :  { %v305_v18 = vpop.permute.xlu1 %304 }
 0x547   :  { %835 = vmatmul.msk.bf16.vlgmr.msrb.gmra.mxu0 %vm181_vm6, %v305_v18 }
 0x5c4   :  { %v318_v19 = vpop.f32.mrf.mxu0 }
 0x5c5   :  { %v323_v20 = vrot.slane %v318_v19, 6 }
 0x5c7   :  { %v325_v21 = vadd.f32 %v323_v20, %v1068_v25 }
 0x5c9   :  { %895 = vtanh.f32 %v325_v21  ;;  %v836_v24 = vmul.f32 -1.442695, %v325_v21 }
 0x5cb   :  { %897 = vpow2.f32 %v836_v24 }
 0x5cc   :  { %v320_v22 = vpop.f32.mrf.mxu0 }
 0x5cf   :  { %v896_v23 = vpop.eup %895 }
 0x5d0   :  { %351 = vrot.lane.b32.xlu2 %v896_v23, %s970_s5 }
 0x5d1   :  { %v898_v26 = vpop.eup %897 }
 0x5d2   :  { %v329_v27 = vadd.f32 1.0, %v898_v26 }
 0x5d4   :  { %899 = vrcp.f32 %v329_v27  ;;  %v341_v33 = vand.u32 2147483648, %v329_v27  ;;  %vm335_vm12 = vweird.f32 %v329_v27  ;;  %v339_v34 = vand.u32 2147483647, %v329_v27 }
 0x5d6   :  { %v342_v36 = vor.u32 1.1754944e-38, %v341_v33  ;;  %vm340_vm14 = vcmp.eq.f32.partialorder %v339_v34, 8.507059e+37 }
 0x5da   :  { %v900_v28 = vpop.eup %899 }
 0x5db   :  { %v331_v29 = vmul.f32 %v900_v28, %v329_v27  ;;  %vm336_vm11 = vweird.f32 %v900_v28 }
 0x5dc   :  { %vm337_vm13 = vmor %vm335_vm12, %vm336_vm11  ;;  %vm701_vm12 = vcmask 1043456  }
 0x5dd   :  { %v332_v30 = vsub.f32 1.0, %v331_v29 }
 0x5df   :  { %v333_v31 = vmul.f32 %v900_v28, %v332_v30 }
 0x5e1   :  { %v334_v32 = vadd.f32 %v900_v28, %v333_v31 }
 0x5e3   :  { %v338_v35 = vsel %vm337_vm13, %v900_v28, %v334_v32 }
 0x5e4   :  { %v343_v38 = vsel %vm340_vm14, %v342_v36, %v338_v35 }
 0x5e5   :  { %v349_v41 = vmul.f32 %v347_v40, %v343_v38 }
 0x62a   :  { %v352_v37 = vpop.permute.xlu2 %351 }
 0x62b   :  { %v354_v39 = vmul.f32 %v352_v37, %v343_v38 }
 0x62d   :  { %356 = vrot.lane.b32.xlu0 %v354_v39, %s971_s6 }
 0x69f   :  { %v357_v42 = vpop.permute.xlu0 %356 }
 0x6a0   :  { %v359_v43 = vadd.f32 %v357_v42, %v349_v41 }
 0x6a2   :  { %901 = vtanh.f32 %v359_v43  ;;  %v412_v8 = vrot.slane %v359_v43, 7 }
 0x6a8   :  { %v902_v44 = vpop.eup %901 }
 0x6a9   :  { %362 = vrot.lane.b32.xlu1 %v902_v44, %s970_s5 }
 0x71b   :  { %v363_v45 = vpop.permute.xlu1 %362 }
 0x71c   :  { %v365_v46 = vmul.f32 %v363_v45, %v343_v38 }
 0x71e   :  { %v366_v48 = vpack.c.bf16 %v365_v46, %v365_v46  ;;  %v698_v49 = vsel %vm697_vm0, %v696_v47, %v365_v46 }
 0x720   :  { %v368_v51 = vrot.slane %v366_v48, 1 }
 0x722   :  { %369 = vrot.lane.b32.xlu2 %v368_v51, %s971_s6 }
 0x77c   :  { %v370_v52 = vpop.permute.xlu2 %369 }
 0x77d   :  { %837 = vmatmul.msk.bf16.vlgmr.msrb.gmra.mxu1 %vm181_vm6, %v370_v52 }
 0x7fa   :  { %v383_v53 = vpop.f32.mrf.mxu1 }
 0x7fb   :  { %v388_v54 = vrot.slane %v383_v53, 5 }
 0x7fd   :  { %v390_v55 = vadd.f32 %v388_v54, %v1068_v25 }
 0x7ff   :  { %903 = vtanh.f32 %v390_v55  ;;  %v838_v58 = vmul.f32 -1.442695, %v390_v55 }
 0x801   :  { %905 = vpow2.f32 %v838_v58 }
 0x802   :  { %v385_v56 = vpop.f32.mrf.mxu1 }
 0x805   :  { %v904_v57 = vpop.eup %903 }
 0x806   :  { %416 = vrot.lane.b32.xlu0 %v904_v57, %s970_s5 }
 0x807   :  { %v906_v50 = vpop.eup %905 }
 0x808   :  { %v394_v59 = vadd.f32 1.0, %v906_v50 }
 0x80a   :  { %907 = vrcp.f32 %v394_v59  ;;  %v406_v1 = vand.u32 2147483648, %v394_v59  ;;  %vm400_vm3 = vweird.f32 %v394_v59  ;;  %v404_v2 = vand.u32 2147483647, %v394_v59 }
 0x80c   :  { %v407_v4 = vor.u32 1.1754944e-38, %v406_v1  ;;  %vm405_vm5 = vcmp.eq.f32.partialorder %v404_v2, 8.507059e+37 }
 0x810   :  { %v908_v60 = vpop.eup %907 }
 0x811   :  { %v396_v61 = vmul.f32 %v908_v60, %v394_v59  ;;  %vm401_vm2 = vweird.f32 %v908_v60 }
 0x812   :  { %vm402_vm4 = vmor %vm400_vm3, %vm401_vm2  ;;  %vm703_vm2 = vcmask 1044480  }
 0x813   :  { %v397_v62 = vsub.f32 1.0, %v396_v61 }
 0x815   :  { %v398_v63 = vmul.f32 %v908_v60, %v397_v62 }
 0x817   :  { %v399_v0 = vadd.f32 %v908_v60, %v398_v63 }
 0x819   :  { %v403_v3 = vsel %vm402_vm4, %v908_v60, %v399_v0 }
 0x81a   :  { %v408_v6 = vsel %vm405_vm5, %v407_v4, %v403_v3 }
 0x81b   :  { %v414_v9 = vmul.f32 %v412_v8, %v408_v6 }
 0x878   :  { %v417_v5 = vpop.permute.xlu0 %416 }
 0x879   :  { %v419_v7 = vmul.f32 %v417_v5, %v408_v6 }
 0x87b   :  { %421 = vrot.lane.b32.xlu1 %v419_v7, %s971_s6 }
 0x8ed   :  { %v422_v10 = vpop.permute.xlu1 %421 }
 0x8ee   :  { %v424_v11 = vadd.f32 %v422_v10, %v414_v9 }
 0x8f0   :  { %909 = vtanh.f32 %v424_v11  ;;  %v479_v41 = vrot.slane %v424_v11, 7 }
 0x8f6   :  { %v910_v12 = vpop.eup %909 }
 0x8f7   :  { %427 = vrot.lane.b32.xlu2 %v910_v12, %s970_s5 }
 0x951   :  { %v428_v13 = vpop.permute.xlu2 %427 }
 0x952   :  { %v430_v14 = vmul.f32 %v428_v13, %v408_v6 }
 0x954   :  { %v431_v15 = vpack.c.bf16 %v430_v14, %v430_v14  ;;  %v700_v16 = vsel %vm699_vm7, %v698_v49, %v430_v14 }
 0x956   :  { %v433_v17 = vshrl.u32 %v431_v15, 16 }
 0x958   :  { %v435_v18 = vrot.slane %v433_v17, 1 }
 0x95a   :  { %436 = vrot.lane.b32.xlu0 %v435_v18, %s971_s6 }
 0x9cc   :  { %v437_v19 = vpop.permute.xlu0 %436 }
 0x9cd   :  { %839 = vmatmul.msk.bf16.vlgmr.msra.gmra.mxu2 %vm181_vm6, %v437_v19 }
 0xa50   :  { %v450_v20 = vpop.f32.mrf.mxu2 }
 0xa51   :  { %v455_v21 = vrot.slane %v450_v20, 4 }
 0xa53   :  { %v457_v22 = vadd.f32 %v455_v21, %v1068_v25 }
 0xa55   :  { %911 = vtanh.f32 %v457_v22  ;;  %v840_v26 = vmul.f32 -1.442695, %v457_v22 }
 0xa57   :  { %913 = vpow2.f32 %v840_v26 }
 0xa58   :  { %v452_v23 = vpop.f32.mrf.mxu2 }
 0xa5b   :  { %v912_v24 = vpop.eup %911 }
 0xa5c   :  { %483 = vrot.lane.b32.xlu1 %v912_v24, %s970_s5 }
 0xa5d   :  { %v914_v27 = vpop.eup %913 }
 0xa5e   :  { %v461_v28 = vadd.f32 1.0, %v914_v27 }
 0xa60   :  { %915 = vrcp.f32 %v461_v28  ;;  %v473_v34 = vand.u32 2147483648, %v461_v28  ;;  %vm467_vm9 = vweird.f32 %v461_v28  ;;  %v471_v35 = vand.u32 2147483647, %v461_v28 }
 0xa62   :  { %v474_v37 = vor.u32 1.1754944e-38, %v473_v34  ;;  %vm472_vm11 = vcmp.eq.f32.partialorder %v471_v35, 8.507059e+37 }
 0xa66   :  { %v916_v29 = vpop.eup %915 }
 0xa67   :  { %v463_v30 = vmul.f32 %v916_v29, %v461_v28  ;;  %vm468_vm8 = vweird.f32 %v916_v29 }
 0xa68   :  { %vm469_vm10 = vmor %vm467_vm9, %vm468_vm8  ;;  %vm705_vm8 = vcmask 1045504  }
 0xa69   :  { %v464_v31 = vsub.f32 1.0, %v463_v30 }
 0xa6b   :  { %v465_v32 = vmul.f32 %v916_v29, %v464_v31 }
 0xa6d   :  { %v466_v33 = vadd.f32 %v916_v29, %v465_v32 }
 0xa6f   :  { %v470_v36 = vsel %vm469_vm10, %v916_v29, %v466_v33 }
 0xa70   :  { %v475_v39 = vsel %vm472_vm11, %v474_v37, %v470_v36 }
 0xa71   :  { %v481_v42 = vmul.f32 %v479_v41, %v475_v39 }
 0xace   :  { %v484_v38 = vpop.permute.xlu1 %483 }
 0xacf   :  { %v486_v40 = vmul.f32 %v484_v38, %v475_v39 }
 0xad1   :  { %488 = vrot.lane.b32.xlu2 %v486_v40, %s971_s6 }
 0xb2b   :  { %v489_v43 = vpop.permute.xlu2 %488 }
 0xb2c   :  { %v491_v44 = vadd.f32 %v489_v43, %v481_v42 }
 0xb2e   :  { %917 = vtanh.f32 %v491_v44  ;;  %v544_v8 = vrot.slane %v491_v44, 7 }
 0xb34   :  { %v918_v45 = vpop.eup %917 }
 0xb35   :  { %494 = vrot.lane.b32.xlu0 %v918_v45, %s970_s5 }
 0xba7   :  { %v495_v46 = vpop.permute.xlu0 %494 }
 0xba8   :  { %v497_v47 = vmul.f32 %v495_v46, %v475_v39 }
 0xbaa   :  { %v498_v48 = vpack.c.bf16 %v497_v47, %v497_v47  ;;  %v702_v49 = vsel %vm701_vm12, %v700_v16, %v497_v47 }
 0xbac   :  { %v500_v51 = vrot.slane %v498_v48, 2 }
 0xbae   :  { %501 = vrot.lane.b32.xlu1 %v500_v51, %s971_s6 }
 0xc20   :  { %v502_v52 = vpop.permute.xlu1 %501 }
 0xc21   :  { %841 = vmatmul.msk.bf16.vlgmr.msra.gmra.mxu3 %vm181_vm6, %v502_v52 }
 0xca4   :  { %v515_v53 = vpop.f32.mrf.mxu3 }
 0xca5   :  { %v520_v54 = vrot.slane %v515_v53, 3 }
 0xca7   :  { %v522_v55 = vadd.f32 %v520_v54, %v1068_v25 }
 0xca9   :  { %919 = vtanh.f32 %v522_v55  ;;  %v842_v58 = vmul.f32 -1.442695, %v522_v55 }
 0xcab   :  { %921 = vpow2.f32 %v842_v58 }
 0xcac   :  { %v517_v56 = vpop.f32.mrf.mxu3 }
 0xcaf   :  { %v920_v57 = vpop.eup %919 }
 0xcb0   :  { %548 = vrot.lane.b32.xlu2 %v920_v57, %s970_s5 }
 0xcb1   :  { %v922_v50 = vpop.eup %921 }
 0xcb2   :  { %v526_v59 = vadd.f32 1.0, %v922_v50 }
 0xcb4   :  { %923 = vrcp.f32 %v526_v59  ;;  %v538_v1 = vand.u32 2147483648, %v526_v59  ;;  %vm532_vm14 = vweird.f32 %v526_v59  ;;  %v536_v2 = vand.u32 2147483647, %v526_v59 }
 0xcb6   :  { %v539_v4 = vor.u32 1.1754944e-38, %v538_v1  ;;  %vm537_vm0 = vcmp.eq.f32.partialorder %v536_v2, 8.507059e+37 }
 0xcba   :  { %v924_v60 = vpop.eup %923 }
 0xcbb   :  { %v528_v61 = vmul.f32 %v924_v60, %v526_v59  ;;  %vm533_vm13 = vweird.f32 %v924_v60 }
 0xcbc   :  { %vm534_vm15 = vmor %vm532_vm14, %vm533_vm13  ;;  %vm707_vm13 = vcmask 1046528  }
 0xcbd   :  { %v529_v62 = vsub.f32 1.0, %v528_v61 }
 0xcbf   :  { %v530_v63 = vmul.f32 %v924_v60, %v529_v62 }
 0xcc1   :  { %v531_v0 = vadd.f32 %v924_v60, %v530_v63 }
 0xcc3   :  { %v535_v3 = vsel %vm534_vm15, %v924_v60, %v531_v0 }
 0xcc4   :  { %v540_v6 = vsel %vm537_vm0, %v539_v4, %v535_v3 }
 0xcc5   :  { %v546_v9 = vmul.f32 %v544_v8, %v540_v6 }
 0xd0a   :  { %v549_v5 = vpop.permute.xlu2 %548 }
 0xd0b   :  { %v551_v7 = vmul.f32 %v549_v5, %v540_v6 }
 0xd0d   :  { %553 = vrot.lane.b32.xlu0 %v551_v7, %s971_s6 }
 0xd7f   :  { %v554_v10 = vpop.permute.xlu0 %553 }
 0xd80   :  { %v556_v11 = vadd.f32 %v554_v10, %v546_v9 }
 0xd82   :  { %925 = vtanh.f32 %v556_v11  ;;  %v611_v41 = vrot.slane %v556_v11, 7 }
 0xd88   :  { %v926_v12 = vpop.eup %925 }
 0xd89   :  { %559 = vrot.lane.b32.xlu1 %v926_v12, %s970_s5  ;;  %v870_v12 = vld [vmem:[%s1149_s7 + $0x8] sm:$0xff] }
 0xd8a   :  { %742 = vmatpush.bf16.msrb.mxu2 %v870_v12 }
 0xdfb   :  { %v560_v13 = vpop.permute.xlu1 %559 }
 0xdfc   :  { %v562_v14 = vmul.f32 %v560_v13, %v540_v6  ;;  %v869_v13 = vld [vmem:[%s1149_s7] sm:$0xff] }
 0xdfd   :  { %743 = vmatpush.bf16.msrb.mxu2 %v869_v13 }
 0xdfe   :  { %v563_v15 = vpack.c.bf16 %v562_v14, %v562_v14  ;;  %v704_v16 = vsel %vm703_vm2, %v702_v49, %v562_v14 }
 0xe00   :  { %v565_v17 = vshrl.u32 %v563_v15, 16 }
 0xe02   :  { %v567_v18 = vrot.slane %v565_v17, 2 }
 0xe04   :  { %568 = vrot.lane.b32.xlu2 %v567_v18, %s971_s6  ;;  %v871_v18 = vld [vmem:[%s1151_s9] sm:$0xff]  ;;  %s972_s9 = smov [#allocation2]  }
 0xe05   :  { %773 = vmatpush.bf16.msrb.mxu3 %v871_v18  ;;  %s785_s24 = sshll.u32 %s972_s9, 4  ;;  %s786_s24 = int_to_ptr.vmem [resolvable:$true] %s785_s24 }
 0xe5e   :  { %v569_v19 = vpop.permute.xlu2 %568 }
 0xe5f   :  { %843 = vmatmul.msk.bf16.vlgmr.msra.gmra.mxu0 %vm181_vm6, %v569_v19 }
 0xedc   :  { %v582_v20 = vpop.f32.mrf.mxu0 }
 0xedd   :  { %v587_v21 = vrot.slane %v582_v20, 2  ;;  %v877_v20 = vld [vmem:[%s1150_s8] ss:$0 sm:$0xff] }
 0xedf   :  { %v589_v22 = vadd.f32 %v587_v21, %v1068_v25 }
 0xee1   :  { %927 = vtanh.f32 %v589_v22  ;;  %v844_v26 = vmul.f32 -1.442695, %v589_v22 }
 0xee3   :  { %929 = vpow2.f32 %v844_v26 }
 0xee4   :  { %v584_v23 = vpop.f32.mrf.mxu0 }
 0xee7   :  { %v928_v24 = vpop.eup %927 }
 0xee8   :  { %615 = vrot.lane.b32.xlu0 %v928_v24, %s970_s5 }
 0xee9   :  { %v930_v27 = vpop.eup %929 }
 0xeea   :  { %v593_v28 = vadd.f32 1.0, %v930_v27  ;;  %v878_v27 = vld [vmem:[%s1152_s10] ss:$0 sm:$0xff] }
 0xeec   :  { %931 = vrcp.f32 %v593_v28  ;;  %v605_v34 = vand.u32 2147483648, %v593_v28  ;;  %vm599_vm4 = vweird.f32 %v593_v28  ;;  %v603_v35 = vand.u32 2147483647, %v593_v28 }
 0xeee   :  { %v606_v37 = vor.u32 1.1754944e-38, %v605_v34  ;;  %vm604_vm7 = vcmp.eq.f32.partialorder %v603_v35, 8.507059e+37 }
 0xef2   :  { %v932_v29 = vpop.eup %931 }
 0xef3   :  { %v595_v30 = vmul.f32 %v932_v29, %v593_v28  ;;  %vm600_vm3 = vweird.f32 %v932_v29 }
 0xef4   :  { %vm601_vm5 = vmor %vm599_vm4, %vm600_vm3 }
 0xef5   :  { %v596_v31 = vsub.f32 1.0, %v595_v30 }
 0xef7   :  { %v597_v32 = vmul.f32 %v932_v29, %v596_v31 }
 0xef9   :  { %v598_v33 = vadd.f32 %v932_v29, %v597_v32 }
 0xefb   :  { %v602_v36 = vsel %vm601_vm5, %v932_v29, %v598_v33 }
 0xefc   :  { %v607_v39 = vsel %vm604_vm7, %v606_v37, %v602_v36 }
 0xefd   :  { %v613_v42 = vmul.f32 %v611_v41, %v607_v39 }
 0xf5a   :  { %v616_v38 = vpop.permute.xlu0 %615 }
 0xf5b   :  { %v618_v40 = vmul.f32 %v616_v38, %v607_v39 }
 0xf5d   :  { %620 = vrot.lane.b32.xlu1 %v618_v40, %s971_s6 }
 0xfcf   :  { %v621_v43 = vpop.permute.xlu1 %620 }
 0xfd0   :  { %v623_v44 = vadd.f32 %v621_v43, %v613_v42 }
 0xfd2   :  { %933 = vtanh.f32 %v623_v44  ;;  %v676_v7 = vrot.slane %v623_v44, 7 }
 0xfd8   :  { %v934_v45 = vpop.eup %933 }
 0xfd9   :  { %626 = vrot.lane.b32.xlu2 %v934_v45, %s970_s5 }
0x1033   :  { %v627_v46 = vpop.permute.xlu2 %626 }
0x1034   :  { %v629_v47 = vmul.f32 %v627_v46, %v607_v39 }
0x1036   :  { %v630_v48 = vpack.c.bf16 %v629_v47, %v629_v47  ;;  %v706_v49 = vsel %vm705_vm8, %v704_v16, %v629_v47 }
0x1038   :  { %v632_v51 = vrot.slane %v630_v48, 3 }
0x103a   :  { %633 = vrot.lane.b32.xlu0 %v632_v51, %s971_s6 }
0x10ac   :  { %v634_v52 = vpop.permute.xlu0 %633 }
0x10ad   :  { %845 = vmatmul.msk.bf16.vlgmr.msra.gmra.mxu1 %vm181_vm6, %v634_v52 }
0x112a   :  { %v647_v53 = vpop.f32.mrf.mxu1 }
0x112b   :  { %v652_v54 = vrot.slane %v647_v53, 1 }
0x112d   :  { %v654_v55 = vadd.f32 %v652_v54, %v1068_v25 }
0x112f   :  { %935 = vtanh.f32 %v654_v55  ;;  %v846_v58 = vmul.f32 -1.442695, %v654_v55 }
0x1131   :  { %937 = vpow2.f32 %v846_v58 }
0x1132   :  { %v649_v56 = vpop.f32.mrf.mxu1 }
0x1135   :  { %v936_v57 = vpop.eup %935 }
0x1136   :  { %680 = vrot.lane.b32.xlu1 %v936_v57, %s970_s5 }
0x1137   :  { %v938_v50 = vpop.eup %937 }
0x1138   :  { %v658_v59 = vadd.f32 1.0, %v938_v50 }
0x113a   :  { %939 = vrcp.f32 %v658_v59  ;;  %v670_v1 = vand.u32 2147483648, %v658_v59  ;;  %vm664_vm10 = vweird.f32 %v658_v59  ;;  %v668_v2 = vand.u32 2147483647, %v658_v59 }
0x113c   :  { %v671_v3 = vor.u32 1.1754944e-38, %v670_v1  ;;  %vm669_vm12 = vcmp.eq.f32.partialorder %v668_v2, 8.507059e+37 }
0x1140   :  { %v940_v60 = vpop.eup %939 }
0x1141   :  { %v660_v61 = vmul.f32 %v940_v60, %v658_v59  ;;  %vm665_vm9 = vweird.f32 %v940_v60 }
0x1142   :  { %vm666_vm11 = vmor %vm664_vm10, %vm665_vm9 }
0x1143   :  { %v661_v62 = vsub.f32 1.0, %v660_v61 }
0x1145   :  { %v662_v63 = vmul.f32 %v940_v60, %v661_v62 }
0x1147   :  { %v663_v0 = vadd.f32 %v940_v60, %v662_v63 }
0x1149   :  { %v667_v25 = vsel %vm666_vm11, %v940_v60, %v663_v0 }
0x114a   :  { %v672_v5 = vsel %vm669_vm12, %v671_v3, %v667_v25 }
0x114b   :  { %v678_v8 = vmul.f32 %v676_v7, %v672_v5 }
0x11a8   :  { %v681_v4 = vpop.permute.xlu1 %680 }
0x11a9   :  { %v683_v6 = vmul.f32 %v681_v4, %v672_v5 }
0x11ab   :  { %685 = vrot.lane.b32.xlu2 %v683_v6, %s971_s6 }
0x1205   :  { %v686_v9 = vpop.permute.xlu2 %685 }
0x1206   :  { %v688_v10 = vadd.f32 %v686_v9, %v678_v8 }
0x1208   :  { %941 = vtanh.f32 %v688_v10 }
0x120e   :  { %v942_v11 = vpop.eup %941 }
0x120f   :  { %691 = vrot.lane.b32.xlu0 %v942_v11, %s970_s5 }
0x1281   :  { %v692_v14 = vpop.permute.xlu0 %691 }
0x1282   :  { %v694_v15 = vmul.f32 %v692_v14, %v672_v5 }
0x1284   :  { %v708_v16 = vsel %vm707_vm13, %v706_v49, %v694_v15 }
0x1285   :  { %v709_v17 = vpack.c.bf16 %v708_v16, %v708_v16 }
0x1287   :  { %719 = vrot.lane.b32.xlu1 %v709_v17, %s971_s6 }
0x12f9   :  { %v720_v19 = vpop.permute.xlu1 %719 }
0x12fa   :  { %855 = vmatmul.msk.bf16.vlgmr.msrb.gmra.mxu2 %vm181_vm6, %v720_v19 }
0x137d   :  { %v745_v21 = vpop.f32.mrf.mxu2 }
0x137e   :  { %v746_v22 = vadd.f32 %v877_v20, %v745_v21 }
0x1380   :  { %v749_v23 = vmax.f32 %v746_v22, 0.0 }
0x1382   :  { %v750_v24 = vpack.c.bf16 %v749_v23, %v749_v23 }
0x1384   :  { %860 = vmatmul.msk.bf16.vlgmr.msrb.gmra.mxu3 %vm121_vm1, %v750_v24 }
0x1385   :  { %v747_v26 = vpop.f32.mrf.mxu2 }
0x1407   :  { %v775_v28 = vpop.f32.mrf.mxu3 }
0x1408   :  { %v776_v29 = vadd.f32 %v878_v27, %v775_v28 }
0x140a   :  { %779 = vst [vmem:[#allocation2] sm:$0xff] %v776_v29 }
0x140b   :  { %790 = dma.vmem_to_hbm [thread:$0]  %s786_s24, 128, %s788_s27, [#allocation3]  }
0x140f   :  { %v777_v30 = vpop.f32.mrf.mxu3 }
0x1410   :  { %967 = dma.done.wait [#allocation3], 128  }
0x1411   :  { %968 = vsyncadd [#allocation3], 4294967168 }
0x1412   :  { %795 = vsyncpa [#allocation3], 1 }

</bundles_post_ra>
